<compile_context>
chip_gen: v6e
topology: v6e:2x2x1
jax: 0.10.0
libtpu: 0.0.40
codegen_flags: <defaults>
</compile_context>

<pallas_src>
import functools

import jax
import jax.numpy as jnp
from jax.experimental import pallas as pl
from jax.experimental.pallas import tpu as pltpu


def _hardswish(x):
    # x * relu6(x + 3) / 6
    return x * jnp.clip(x + 3.0, 0.0, 6.0) * (1.0 / 6.0)


def actor_sac_kernel(x_ref, w1_ref, b1_ref, w2_ref, b2_ref,
                     w3_ref, b3_ref, w4_ref, b4_ref, o_ref):
    # bf16 MXU operands, f32 accumulation; elementwise math stays f32 (v5e-safe).
    x = x_ref[...].astype(jnp.bfloat16)

    # net__state: Linear -> ReLU -> Linear -> ReLU
    h1 = jnp.dot(x, w1_ref[...], preferred_element_type=jnp.float32) + b1_ref[...]
    h1 = jnp.maximum(h1, 0.0)
    h2 = jnp.dot(h1.astype(jnp.bfloat16), w2_ref[...],
                 preferred_element_type=jnp.float32) + b2_ref[...]
    h2 = jnp.maximum(h2, 0.0)

    # net_action: Linear -> Hardswish -> Linear, then tanh
    h3 = jnp.dot(h2.astype(jnp.bfloat16), w3_ref[...],
                 preferred_element_type=jnp.float32) + b3_ref[...]
    h3 = _hardswish(h3)
    h4 = jnp.dot(h3.astype(jnp.bfloat16), w4_ref[...],
                 preferred_element_type=jnp.float32) + b4_ref[...]
    o_ref[...] = jnp.tanh(h4)


def _round_up(n, m):
    return ((n + m - 1) // m) * m


def _pad2d(a, rows, cols):
    return jnp.pad(a, ((0, rows - a.shape[0]), (0, cols - a.shape[1])))


_VMEM_BUDGET = 40 * (1 << 20)        # shrink TB if the estimate exceeds this
_VMEM_LIMIT_FLOOR = 16 * (1 << 20)   # never request less than the common default
_VMEM_LIMIT_CAP = 48 * (1 << 20)     # stay under v7x's 64 MiB physical VMEM


def _batch_tile(B):
    """Batch tile size.

    Tiny RL batches -> one 8-aligned tile (splitting only adds per-step overhead).
    B >= 64 -> at least 2 grid steps so v7x's second TensorCore gets work, with the
    tile capped at 512 rows to amortize per-step pipeline overhead at large batch.
    """
    Bp8 = _round_up(B, 8)
    if Bp8 < 64:
        return Bp8
    return min(512, _round_up((Bp8 + 1) // 2, 8))


def _vmem_estimate(TB, S, Mp, Ap, param_bytes):
    """Rough VMEM footprint: single-buffered params + double-buffered x/out tiles
    + f32 intermediates (h1..h3 plus slack)."""
    io = 2 * (TB * S * 4 + TB * Ap * 4)
    interm = 4 * TB * Mp * 4
    return param_bytes + io + interm


def prepare_params(params):
    """Pad + cast parameters ONCE (call at init, not per forward step).
    Weights -> bf16 [in, out_p] (pre-transposed for x @ W); biases -> f32 [1, out_p].
    Only the OUTPUT feature dims are padded to 128; W1 keeps its true state_dim rows
    so the input never has to be feature-padded in the hot path."""
    w1, b1, w2, b2, w3, b3, w4, b4 = params
    S, M = w1.shape
    A = w4.shape[1]
    Mp, Ap = _round_up(M, 128), _round_up(A, 128)

    w1_p = _pad2d(w1, S, Mp).astype(jnp.bfloat16)      # (state_dim, Mp) — no K pad
    w2_p = _pad2d(w2, Mp, Mp).astype(jnp.bfloat16)
    w3_p = _pad2d(w3, Mp, Mp).astype(jnp.bfloat16)
    w4_p = _pad2d(w4, Mp, Ap).astype(jnp.bfloat16)
    b1_p = _pad2d(b1.astype(jnp.float32).reshape(1, -1), 1, Mp)
    b2_p = _pad2d(b2.astype(jnp.float32).reshape(1, -1), 1, Mp)
    b3_p = _pad2d(b3.astype(jnp.float32).reshape(1, -1), 1, Mp)
    b4_p = _pad2d(b4.astype(jnp.float32).reshape(1, -1), 1, Ap)
    return (w1_p, b1_p, w2_p, b2_p, w3_p, b3_p, w4_p, b4_p)


@functools.partial(jax.jit, static_argnames=("action_dim",))
def actor_sac_forward(state, padded_params, action_dim):
    """state: [B, state_dim] float32. Returns tanh(net_action(net__state(state)))."""
    w1, b1, w2, b2, w3, b3, w4, b4 = padded_params
    B, S = state.shape
    Mp = w1.shape[1]
    Ap = w4.shape[1]
    param_bytes = sum(int(p.size) * p.dtype.itemsize for p in padded_params)

    TB = _batch_tile(B)
    # Keep the explicit VMEM budget (v5e 16 MiB scoped default, v7x 64 MiB physical).
    while TB > 8 and _vmem_estimate(TB, S, Mp, Ap, param_bytes) > _VMEM_BUDGET:
        TB = max(8, _round_up(TB // 2, 8))
    Bp = _round_up(B, TB)
    grid = (Bp // TB,)

    x = state.astype(jnp.float32)
    if Bp != B:
        # Padded rows are zero inputs; they still pick up the bias and flow through
        # ReLU/Hardswish/tanh (finite values) and are sliced off below — exact for
        # this row-wise computation.  Only the batch dim is padded; the feature
        # (contraction) dim stays at its true size.
        x = jnp.pad(x, ((0, Bp - B), (0, 0)))

    x_spec = pl.BlockSpec((TB, S), lambda i: (i, 0))
    out_spec = pl.BlockSpec((TB, Ap), lambda i: (i, 0))

    def resident(arr):
        # Whole array, constant block index -> stays VMEM-resident across grid
        # steps.  Single-buffered: the block never changes, so double-buffering
        # would only double the resident-weight VMEM footprint.
        return pl.BlockSpec(arr.shape, lambda i: (0, 0),
                            pipeline_mode=pl.Buffered(1))

    flops = 2 * Bp * (S * Mp + 2 * Mp * Mp + Mp * Ap)
    bytes_accessed = Bp * S * 4 + Bp * Ap * 4 + param_bytes
    cost = pl.CostEstimate(flops=flops, transcendentals=Bp * Ap,
                           bytes_accessed=bytes_accessed)

    vmem_limit = int(min(_VMEM_LIMIT_CAP,
                         max(_VMEM_LIMIT_FLOOR,
                             1.3 * _vmem_estimate(TB, S, Mp, Ap, param_bytes))))

    out = pl.pallas_call(
        actor_sac_kernel,
        out_shape=jax.ShapeDtypeStruct((Bp, Ap), jnp.float32),
        grid=grid,
        in_specs=[x_spec,
                  resident(w1), resident(b1),
                  resident(w2), resident(b2),
                  resident(w3), resident(b3),
                  resident(w4), resident(b4)],
        out_specs=out_spec,
        compiler_params=pltpu.CompilerParams(
            dimension_semantics=("parallel",),
            vmem_limit_bytes=vmem_limit),
        cost_estimate=cost,
    )(x, w1, b1, w2, b2, w3, b3, w4, b4)

    if Bp == B and Ap == action_dim:
        return out
    return out[:B, :action_dim]


def init_params(key, state_dim, mid_dim, action_dim):
    """PyTorch-style uniform(-1/sqrt(fan_in), 1/sqrt(fan_in)) init.
    Weights stored as [in_dim, out_dim] (already transposed for x @ W)."""
    def linear(k, fan_in, fan_out):
        kw, kb = jax.random.split(k)
        bound = 1.0 / jnp.sqrt(fan_in)
        w = jax.random.uniform(kw, (fan_in, fan_out), jnp.float32, -bound, bound)
        b = jax.random.uniform(kb, (fan_out,), jnp.float32, -bound, bound)
        return w, b

    k1, k2, k3, k4 = jax.random.split(key, 4)
    w1, b1 = linear(k1, state_dim, mid_dim)
    w2, b2 = linear(k2, mid_dim, mid_dim)
    w3, b3 = linear(k3, mid_dim, mid_dim)
    w4, b4 = linear(k4, mid_dim, action_dim)
    return (w1, b1, w2, b2, w3, b3, w4, b4)


def reference_forward(state, params):
    """Pure-JAX reference mirroring the kernel's bf16-matmul / f32-accumulate path."""
    w1, b1, w2, b2, w3, b3, w4, b4 = params

    def dot(a, w):
        return jnp.dot(a.astype(jnp.bfloat16), w.astype(jnp.bfloat16),
                       preferred_element_type=jnp.float32)

    h = jnp.maximum(dot(state, w1) + b1, 0.0)
    h = jnp.maximum(dot(h, w2) + b2, 0.0)
    h = _hardswish(dot(h, w3) + b3)
    return jnp.tanh(dot(h, w4) + b4)


def reference_forward_f32(state, params):
    w1, b1, w2, b2, w3, b3, w4, b4 = params
    h = jnp.maximum(state @ w1 + b1, 0.0)
    h = jnp.maximum(h @ w2 + b2, 0.0)
    h = _hardswish(h @ w3 + b3)
    return jnp.tanh(h @ w4 + b4)


if __name__ == "__main__":
    batch, state_dim, mid_dim, action_dim = 2, 16, 32, 4

    key = jax.random.PRNGKey(0)
    k_params, k_state = jax.random.split(key)
    params = init_params(k_params, state_dim, mid_dim, action_dim)
    state = jax.random.normal(k_state, (batch, state_dim), jnp.float32)

    # Pad/cast weights once, outside the per-step hot path.
    padded_params = prepare_params(params)

    out = actor_sac_forward(state, padded_params, action_dim)
    out = jax.block_until_ready(out)

    ref_bf16 = reference_forward(state, params)       # same dtype path as kernel
    ref_f32 = reference_forward_f32(state, params)    # full-precision sanity check

    assert out.shape == (batch, action_dim)
    assert jnp.allclose(out, ref_bf16, atol=1e-3, rtol=1e-3), "mismatch vs bf16 reference"
    assert jnp.allclose(out, ref_f32, atol=3e-2, rtol=3e-2), "mismatch vs f32 reference"

    print("KERNEL_OK")
</pallas_src>

<mosaic_0001>
module attributes {stable_mosaic.version = 11 : i64} {
  func.func @actor_sac_kernel(%arg0: i32, %arg1: memref<8x16xf32, #tpu.memory_space<vmem>>, %arg2: memref<16x128xbf16, #tpu.memory_space<vmem>>, %arg3: memref<1x128xf32, #tpu.memory_space<vmem>>, %arg4: memref<128x128xbf16, #tpu.memory_space<vmem>>, %arg5: memref<1x128xf32, #tpu.memory_space<vmem>>, %arg6: memref<128x128xbf16, #tpu.memory_space<vmem>>, %arg7: memref<1x128xf32, #tpu.memory_space<vmem>>, %arg8: memref<128x128xbf16, #tpu.memory_space<vmem>>, %arg9: memref<1x128xf32, #tpu.memory_space<vmem>>, %arg10: memref<8x128xf32, #tpu.memory_space<vmem>>) attributes {dimension_semantics = [#tpu.dimension_semantics<parallel>], iteration_bounds = array<i64: 1>, scalar_prefetch = 0 : i64, scratch_operands = 0 : i64, tpu.core_type = #tpu.core_type<tc>, window_params = [{transform_indices = @transform_0, window_bounds = array<i64: 8, 16>}, {pipeline_mode = #tpu.pipeline_mode<synchronous>, transform_indices = @transform_1, window_bounds = array<i64: 16, 128>}, {pipeline_mode = #tpu.pipeline_mode<synchronous>, transform_indices = @transform_2, window_bounds = array<i64: 1, 128>}, {pipeline_mode = #tpu.pipeline_mode<synchronous>, transform_indices = @transform_3, window_bounds = array<i64: 128, 128>}, {pipeline_mode = #tpu.pipeline_mode<synchronous>, transform_indices = @transform_4, window_bounds = array<i64: 1, 128>}, {pipeline_mode = #tpu.pipeline_mode<synchronous>, transform_indices = @transform_5, window_bounds = array<i64: 128, 128>}, {pipeline_mode = #tpu.pipeline_mode<synchronous>, transform_indices = @transform_6, window_bounds = array<i64: 1, 128>}, {pipeline_mode = #tpu.pipeline_mode<synchronous>, transform_indices = @transform_7, window_bounds = array<i64: 128, 128>}, {pipeline_mode = #tpu.pipeline_mode<synchronous>, transform_indices = @transform_8, window_bounds = array<i64: 1, 128>}, {transform_indices = @transform_9, window_bounds = array<i64: 8, 128>}]} {
    %c0 = arith.constant 0 : index
    %c0_0 = arith.constant 0 : index
    %0 = vector.load %arg1[%c0, %c0_0] : memref<8x16xf32, #tpu.memory_space<vmem>>, vector<8x16xf32>
    %1 = arith.truncf %0 : vector<8x16xf32> to vector<8x16xbf16>
    %c0_1 = arith.constant 0 : index
    %c0_2 = arith.constant 0 : index
    %2 = vector.load %arg2[%c0_1, %c0_2] : memref<16x128xbf16, #tpu.memory_space<vmem>>, vector<16x128xbf16>
    %cst = arith.constant dense<0.000000e+00> : vector<8x128xf32>
    %3 = tpu.matmul %1, %2, %cst {dimension_numbers = #tpu.dot_dimension_numbers<[1], [0], [0], [1], [0, 0, 1, 1], [], []>} : vector<8x16xbf16>, vector<16x128xbf16>, vector<8x128xf32> -> vector<8x128xf32>
    %c0_3 = arith.constant 0 : index
    %c0_4 = arith.constant 0 : index
    %4 = vector.load %arg3[%c0_3, %c0_4] : memref<1x128xf32, #tpu.memory_space<vmem>>, vector<1x128xf32>
    %5 = vector.broadcast %4 : vector<1x128xf32> to vector<8x128xf32>
    %6 = arith.addf %3, %5 : vector<8x128xf32>
    %cst_5 = arith.constant 0.000000e+00 : f32
    %7 = vector.broadcast %cst_5 : f32 to vector<8x128xf32>
    %8 = arith.maximumf %6, %7 : vector<8x128xf32>
    %9 = arith.truncf %8 : vector<8x128xf32> to vector<8x128xbf16>
    %c0_6 = arith.constant 0 : index
    %c0_7 = arith.constant 0 : index
    %10 = vector.load %arg4[%c0_6, %c0_7] : memref<128x128xbf16, #tpu.memory_space<vmem>>, vector<128x128xbf16>
    %cst_8 = arith.constant dense<0.000000e+00> : vector<8x128xf32>
    %11 = tpu.matmul %9, %10, %cst_8 {dimension_numbers = #tpu.dot_dimension_numbers<[1], [0], [0], [1], [0, 0, 1, 1], [], []>} : vector<8x128xbf16>, vector<128x128xbf16>, vector<8x128xf32> -> vector<8x128xf32>
    %c0_9 = arith.constant 0 : index
    %c0_10 = arith.constant 0 : index
    %12 = vector.load %arg5[%c0_9, %c0_10] : memref<1x128xf32, #tpu.memory_space<vmem>>, vector<1x128xf32>
    %13 = vector.broadcast %12 : vector<1x128xf32> to vector<8x128xf32>
    %14 = arith.addf %11, %13 : vector<8x128xf32>
    %cst_11 = arith.constant 0.000000e+00 : f32
    %15 = vector.broadcast %cst_11 : f32 to vector<8x128xf32>
    %16 = arith.maximumf %14, %15 : vector<8x128xf32>
    %17 = arith.truncf %16 : vector<8x128xf32> to vector<8x128xbf16>
    %c0_12 = arith.constant 0 : index
    %c0_13 = arith.constant 0 : index
    %18 = vector.load %arg6[%c0_12, %c0_13] : memref<128x128xbf16, #tpu.memory_space<vmem>>, vector<128x128xbf16>
    %cst_14 = arith.constant dense<0.000000e+00> : vector<8x128xf32>
    %19 = tpu.matmul %17, %18, %cst_14 {dimension_numbers = #tpu.dot_dimension_numbers<[1], [0], [0], [1], [0, 0, 1, 1], [], []>} : vector<8x128xbf16>, vector<128x128xbf16>, vector<8x128xf32> -> vector<8x128xf32>
    %c0_15 = arith.constant 0 : index
    %c0_16 = arith.constant 0 : index
    %20 = vector.load %arg7[%c0_15, %c0_16] : memref<1x128xf32, #tpu.memory_space<vmem>>, vector<1x128xf32>
    %21 = vector.broadcast %20 : vector<1x128xf32> to vector<8x128xf32>
    %22 = arith.addf %19, %21 : vector<8x128xf32>
    %cst_17 = arith.constant 3.000000e+00 : f32
    %23 = vector.broadcast %cst_17 : f32 to vector<8x128xf32>
    %24 = arith.addf %22, %23 : vector<8x128xf32>
    %cst_18 = arith.constant 0.000000e+00 : f32
    %cst_19 = arith.constant 6.000000e+00 : f32
    %25 = vector.broadcast %cst_18 : f32 to vector<8x128xf32>
    %26 = arith.maximumf %25, %24 : vector<8x128xf32>
    %27 = vector.broadcast %cst_19 : f32 to vector<8x128xf32>
    %28 = arith.minimumf %27, %26 : vector<8x128xf32>
    %29 = arith.mulf %22, %28 : vector<8x128xf32>
    %cst_20 = arith.constant 0.166666672 : f32
    %30 = vector.broadcast %cst_20 : f32 to vector<8x128xf32>
    %31 = arith.mulf %29, %30 : vector<8x128xf32>
    %32 = arith.truncf %31 : vector<8x128xf32> to vector<8x128xbf16>
    %c0_21 = arith.constant 0 : index
    %c0_22 = arith.constant 0 : index
    %33 = vector.load %arg8[%c0_21, %c0_22] : memref<128x128xbf16, #tpu.memory_space<vmem>>, vector<128x128xbf16>
    %cst_23 = arith.constant dense<0.000000e+00> : vector<8x128xf32>
    %34 = tpu.matmul %32, %33, %cst_23 {dimension_numbers = #tpu.dot_dimension_numbers<[1], [0], [0], [1], [0, 0, 1, 1], [], []>} : vector<8x128xbf16>, vector<128x128xbf16>, vector<8x128xf32> -> vector<8x128xf32>
    %c0_24 = arith.constant 0 : index
    %c0_25 = arith.constant 0 : index
    %35 = vector.load %arg9[%c0_24, %c0_25] : memref<1x128xf32, #tpu.memory_space<vmem>>, vector<1x128xf32>
    %36 = vector.broadcast %35 : vector<1x128xf32> to vector<8x128xf32>
    %37 = arith.addf %34, %36 : vector<8x128xf32>
    %38 = math.tanh %37 : vector<8x128xf32>
    %c0_26 = arith.constant 0 : index
    %c0_27 = arith.constant 0 : index
    %39 = vector.load %arg10[%c0_26, %c0_27] : memref<8x128xf32, #tpu.memory_space<vmem>>, vector<8x128xf32>
    tpu.vector_store %arg10[%c0_26, %c0_27], %38 {strides = array<i32>} : memref<8x128xf32, #tpu.memory_space<vmem>>, vector<8x128xf32>,
    return
  }
  func.func @transform_0(%arg0: i32) -> (i32, i32) {
    %c0_i32 = arith.constant 0 : i32
    %c0_i32_0 = arith.constant 0 : i32
    return %arg0, %c0_i32 : i32, i32
  }
  func.func @transform_1(%arg0: i32) -> (i32, i32) {
    %c0_i32 = arith.constant 0 : i32
    %c0_i32_0 = arith.constant 0 : i32
    %c0_i32_1 = arith.constant 0 : i32
    return %c0_i32, %c0_i32_0 : i32, i32
  }
  func.func @transform_2(%arg0: i32) -> (i32, i32) {
    %c0_i32 = arith.constant 0 : i32
    %c0_i32_0 = arith.constant 0 : i32
    %c0_i32_1 = arith.constant 0 : i32
    return %c0_i32, %c0_i32_0 : i32, i32
  }
  func.func @transform_3(%arg0: i32) -> (i32, i32) {
    %c0_i32 = arith.constant 0 : i32
    %c0_i32_0 = arith.constant 0 : i32
    %c0_i32_1 = arith.constant 0 : i32
    return %c0_i32, %c0_i32_0 : i32, i32
  }
  func.func @transform_4(%arg0: i32) -> (i32, i32) {
    %c0_i32 = arith.constant 0 : i32
    %c0_i32_0 = arith.constant 0 : i32
    %c0_i32_1 = arith.constant 0 : i32
    return %c0_i32, %c0_i32_0 : i32, i32
  }
  func.func @transform_5(%arg0: i32) -> (i32, i32) {
    %c0_i32 = arith.constant 0 : i32
    %c0_i32_0 = arith.constant 0 : i32
    %c0_i32_1 = arith.constant 0 : i32
    return %c0_i32, %c0_i32_0 : i32, i32
  }
  func.func @transform_6(%arg0: i32) -> (i32, i32) {
    %c0_i32 = arith.constant 0 : i32
    %c0_i32_0 = arith.constant 0 : i32
    %c0_i32_1 = arith.constant 0 : i32
    return %c0_i32, %c0_i32_0 : i32, i32
  }
  func.func @transform_7(%arg0: i32) -> (i32, i32) {
    %c0_i32 = arith.constant 0 : i32
    %c0_i32_0 = arith.constant 0 : i32
    %c0_i32_1 = arith.constant 0 : i32
    return %c0_i32, %c0_i32_0 : i32, i32
  }
  func.func @transform_8(%arg0: i32) -> (i32, i32) {
    %c0_i32 = arith.constant 0 : i32
    %c0_i32_0 = arith.constant 0 : i32
    %c0_i32_1 = arith.constant 0 : i32
    return %c0_i32, %c0_i32_0 : i32, i32
  }
  func.func @transform_9(%arg0: i32) -> (i32, i32) {
    %c0_i32 = arith.constant 0 : i32
    %c0_i32_0 = arith.constant 0 : i32
    return %arg0, %c0_i32 : i32, i32
  }
}

</mosaic_0001>

<bundles_post_ra>
// kernel: actor_sac_forward.1
= control target key start
LH: loop header
LB: loop body
LE: loop exit
PB: predicated region body
PF: predicated region fallthrough
CT: control target
= control target key end

     0   :  { %14 = vsyncpa [#allocation3], 0  ;;  %s829_s0 = inlined_call_operand.vmem [shape: f32[8,16], index: 0, kind: input, shape index: {}]   ;;  %s830_s1 = inlined_call_operand.vmem [shape: bf16[16,128], index: 1, kind: input, shape index: {}]   ;;  %s831_s2 = inlined_call_operand.vmem [shape: f32[1,128], index: 2, kind: input, shape index: {}]   ;;  %s832_s3 = inlined_call_operand.hbm [shape: bf16[128,128], index: 3, kind: input, shape index: {}]   ;;  %s833_s4 = inlined_call_operand.vmem [shape: f32[1,128], index: 4, kind: input, shape index: {}]   ;;  %s834_s5 = inlined_call_operand.hbm [shape: bf16[128,128], index: 5, kind: input, shape index: {}]   ;;  %s835_s6 = inlined_call_operand.vmem [shape: f32[1,128], index: 6, kind: input, shape index: {}]   ;;  %s836_s7 = inlined_call_operand.hbm [shape: bf16[128,128], index: 7, kind: input, shape index: {}]   ;;  %s837_s8 = inlined_call_operand.vmem [shape: f32[1,128], index: 8, kind: input, shape index: {}]   ;;  %s838_s9 = inlined_call_operand.vmem [shape: f32[8,128], index: 9, kind: output, shape index: {}]  }
   0x1   :  { %15 = vsyncpa [#allocation5], 0  ;;  %s709_s30 = smov [#allocation4]   ;;  %s710_s11 = smov [#allocation2]  }
   0x2   :  { %s41_s10 = sshll.u32 %s709_s30, 4  ;;  %s27_s12 = sshll.u32 %s710_s11, 4  ;;  %s42_s10 = int_to_ptr.vmem [resolvable:$true] %s41_s10  ;;  %s28_s12 = int_to_ptr.vmem [resolvable:$true] %s27_s12 }
   0x3   :  { %s653_s13 = scalar_lea.vmem %s42_s10, 1024  ;;  %p658_p1 = scmp.lt.s32.totalorder %s42_s10, %s42_s10 }
   0x4   :  { %p654_p0 = scmp.ne.s32.totalorder %s42_s10, %s653_s13  ;;  %p659_p2 = scmp.lt.s32.totalorder %s653_s13, %s653_s13 }
   0x6   :  { %p660_p3 = por %p659_p2, %p658_p1 }
   0x8   :  { %p661_p4 = pnand %p660_p3, %p654_p0 }
   0xa   :  { %664 = shalt.err (!%p661_p4)
}
   0xb   :  { %s711_s14 = smov 64   ;;  %s712_s15 = smov 4  }
   0xc   :  { %47 = dma.hbm_to_vmem [thread:$0]  %s834_s5, 1024, %s42_s10, [#allocation5], %s711_s14, %s711_s14, %s712_s15  }
   0xd   :  { %s673_s18 = scalar_lea.vmem %s28_s12, 1024  ;;  %p678_p6 = scmp.lt.s32.totalorder %s28_s12, %s28_s12 }
   0xe   :  { %p674_p5 = scmp.ne.s32.totalorder %s28_s12, %s673_s18  ;;  %p679_p7 = scmp.lt.s32.totalorder %s673_s18, %s673_s18 }
  0x10   :  { %p680_p8 = por %p679_p7, %p678_p6 }
  0x12   :  { %p681_p9 = pnand %p680_p8, %p674_p5 }
  0x14   :  { %684 = shalt.err (!%p681_p9)
}
  0x15   :  { %33 = dma.hbm_to_vmem [thread:$0]  %s832_s3, 1024, %s28_s12, [#allocation3], %s711_s14, %s711_s14, %s712_s15  }
  0x16   :  { %s713_s21 = smov [#allocation6]  }
  0x17   :  { %s55_s22 = sshll.u32 %s713_s21, 4  ;;  %s56_s22 = int_to_ptr.vmem [resolvable:$true] %s55_s22 }
  0x18   :  { %s693_s23 = scalar_lea.vmem %s56_s22, 1024  ;;  %p698_p11 = scmp.lt.s32.totalorder %s56_s22, %s56_s22 }
  0x19   :  { %p694_p10 = scmp.ne.s32.totalorder %s56_s22, %s693_s23  ;;  %p699_p12 = scmp.lt.s32.totalorder %s693_s23, %s693_s23 }
  0x1b   :  { %p700_p13 = por %p699_p12, %p698_p11 }
  0x1d   :  { %p701_p0 = pnand %p700_p13, %p694_p10 }
  0x1f   :  { %704 = shalt.err (!%p701_p0)
}
  0x20   :  { %61 = dma.hbm_to_vmem [thread:$0]  %s836_s7, 1024, %s56_s22, [#allocation5], %s711_s14, %s711_s14, %s712_s15  }
  0x21   :  { %705 = dma.done.wait [#allocation3], 1024  }
  0x22   :  { %706 = vsyncadd [#allocation3], 4294966272 }
  0x23   :  { %707 = dma.done.wait [#allocation5], 2048  }
  0x24   :  { %708 = vsyncadd [#allocation5], 4294965248  ;;  %v714_v0 = vmov 0.0   ;;  %vm715_vm0 = vmmov 0   ;;  %v618_v1 = vld [vmem:[%s830_s1] sm:$0xff]   ;;  %vm91_vm1 = vcmask 130048  }
  0x25   :  { %545 = vmatprep.subr.bf16.mxu0 %v714_v0  ;;  %547 = vmatprep.mubr.msk.bf16.mxu0 %vm715_vm0, %v714_v0  ;;  %v74_v2 = vld [vmem:[%s829_s0] sm:$0xff]  ;;  %v619_v4 = vld [vmem:[#allocation2 + $0x38] sm:$0xff]   ;;  %v620_v5 = vld [vmem:[#allocation2 + $0x30] sm:$0xff]  }
  0x26   :  { %551 = vmatprep.subr.bf16.mxu1 %v714_v0  ;;  %567 = vmatprep.mubr.msk.bf16.mxu1 %vm715_vm0, %v714_v0  ;;  %v75_v3 = vpack.c.bf16 %v74_v2, %v74_v2  ;;  %v621_v6 = vld [vmem:[#allocation2 + $0x28] sm:$0xff]   ;;  %v622_v7 = vld [vmem:[#allocation2 + $0x20] sm:$0xff]   ;;  %v623_v8 = vld [vmem:[#allocation2 + $0x18] sm:$0xff]  }
  0x27   :  { %546 = vmatpush3.bf16.msra.mxu0 %v618_v1  ;;  %552 = vmatpush3.bf16.msra.mxu1 %v619_v4  ;;  %v624_v9 = vld [vmem:[#allocation2 + $0x10] sm:$0xff]   ;;  %v625_v10 = vld [vmem:[#allocation2 + $0x8] sm:$0xff]   ;;  %v626_v11 = vld [vmem:[#allocation2] sm:$0xff]  }
  0x28   :  { %571 = vmatprep.subr.bf16.mxu0 %v714_v0  ;;  %553 = vmatprep.subr.bf16.mxu1 %v714_v0  ;;  %v627_v12 = vld [vmem:[#allocation4 + $0x38] sm:$0xff]   ;;  %v628_v13 = vld [vmem:[#allocation4 + $0x30] sm:$0xff]   ;;  %v629_v14 = vld [vmem:[#allocation4 + $0x28] sm:$0xff]  }
  0x29   :  { %v630_v15 = vld [vmem:[#allocation4 + $0x20] sm:$0xff]   ;;  %v631_v16 = vld [vmem:[#allocation4 + $0x18] sm:$0xff]   ;;  %v632_v17 = vld [vmem:[#allocation4 + $0x10] sm:$0xff]  }
  0x2a   :  { %548 = vmatmul.mubr.msk.bf16.vlgmr.msra.gmra.mxu0 %vm91_vm1, %v75_v3  ;;  %v486_v18 = vld [vmem:[%s831_s2] ss:$0 sm:$0xff]  ;;  %v633_v26 = vld [vmem:[#allocation4 + $0x8] sm:$0xff]   ;;  %v635_v28 = vld [vmem:[#allocation6 + $0x38] sm:$0xff]  }
  0x2b   :  { %587 = vmatprep.mubr.msk.bf16.mxu0 %vm715_vm0, %v714_v0  ;;  %554 = vmatpush3.bf16.msra.mxu1 %v620_v5  ;;  %v634_v27 = vld [vmem:[#allocation4] sm:$0xff]   ;;  %v636_v29 = vld [vmem:[#allocation6 + $0x30] sm:$0xff]   ;;  %v637_v30 = vld [vmem:[#allocation6 + $0x28] sm:$0xff]  }
  0x2c   :  { %555 = vmatprep.subr.bf16.mxu1 %v714_v0  ;;  %572 = vmatpush3.bf16.msra.mxu0 %v627_v12  ;;  %v638_v31 = vld [vmem:[#allocation6 + $0x20] sm:$0xff]   ;;  %v639_v40 = vld [vmem:[#allocation6 + $0x18] sm:$0xff]   ;;  %v640_v41 = vld [vmem:[#allocation6 + $0x10] sm:$0xff]  }
  0x2d   :  { %573 = vmatprep.subr.bf16.mxu0 %v714_v0  ;;  %v489_v32 = vld [vmem:[%s833_s4] ss:$0 sm:$0xff]  ;;  %v641_v42 = vld [vmem:[#allocation6 + $0x8] sm:$0xff]  }
  0x2e   :  { %v642_v43 = vld [vmem:[#allocation6] sm:$0xff]  }
  0x2f   :  { %556 = vmatpush3.bf16.msra.mxu1 %v621_v6  ;;  %v498_v44 = vld [vmem:[%s835_s6] ss:$0 sm:$0xff] }
  0x30   :  { %557 = vmatprep.subr.bf16.mxu1 %v714_v0  ;;  %574 = vmatpush3.bf16.msra.mxu0 %v628_v13  ;;  %v507_v56 = vld [vmem:[%s837_s8] ss:$0 sm:$0xff] }
  0x31   :  { %575 = vmatprep.subr.bf16.mxu0 %v714_v0 }
  0x33   :  { %558 = vmatpush3.bf16.msra.mxu1 %v622_v7 }
  0x34   :  { %559 = vmatprep.subr.bf16.mxu1 %v714_v0  ;;  %576 = vmatpush3.bf16.msra.mxu0 %v629_v14 }
  0x35   :  { %577 = vmatprep.subr.bf16.mxu0 %v714_v0 }
  0x37   :  { %560 = vmatpush3.bf16.msra.mxu1 %v623_v8 }
  0x38   :  { %561 = vmatprep.subr.bf16.mxu1 %v714_v0  ;;  %578 = vmatpush3.bf16.msra.mxu0 %v630_v15 }
  0x39   :  { %579 = vmatprep.subr.bf16.mxu0 %v714_v0 }
  0x3b   :  { %562 = vmatpush3.bf16.msra.mxu1 %v624_v9 }
  0x3c   :  { %563 = vmatprep.subr.bf16.mxu1 %v714_v0  ;;  %580 = vmatpush3.bf16.msra.mxu0 %v631_v16 }
  0x3d   :  { %581 = vmatprep.subr.bf16.mxu0 %v714_v0 }
  0x3f   :  { %564 = vmatpush3.bf16.msra.mxu1 %v625_v10 }
  0x40   :  { %565 = vmatprep.subr.bf16.mxu1 %v714_v0  ;;  %582 = vmatpush3.bf16.msra.mxu0 %v632_v17 }
  0x41   :  { %583 = vmatprep.subr.bf16.mxu0 %v714_v0 }
  0x43   :  { %566 = vmatpush3.bf16.msra.mxu1 %v626_v11 }
  0x44   :  { %591 = vmatprep.subr.bf16.mxu1 %v714_v0  ;;  %584 = vmatpush3.bf16.msra.mxu0 %v633_v26 }
  0x45   :  { %585 = vmatprep.subr.bf16.mxu0 %v714_v0 }
  0x48   :  { %586 = vmatpush3.bf16.msra.mxu0 %v634_v27 }
  0xea   :  { %v129_v19 = vpop.f32.mrf.mxu0 }
  0xeb   :  { %v130_v20 = vadd.f32 %v486_v18, %v129_v19 }
  0xec   :  { %v549_v21 = vpop.f32.mrf.mxu0 }
  0xed   :  { %v135_v22 = vmax.f32 %v130_v20, 0.0 }
  0xee   :  { %v132_v23 = vpop.f32.mrf.mxu0 }
  0xef   :  { %v136_v24 = vpack.c.bf16 %v135_v22, %v135_v22 }
  0xf0   :  { %v550_v25 = vpop.f32.mrf.mxu0 }
  0xf1   :  { %568 = vmatmul.mubr.bf16.vlgmr.msra.gmra.mxu1 %v136_v24 }
  0xf2   :  { %607 = vmatprep.mubr.msk.bf16.mxu1 %vm715_vm0, %v714_v0  ;;  %592 = vmatpush3.bf16.msra.mxu1 %v635_v28 }
  0xf3   :  { %593 = vmatprep.subr.bf16.mxu1 %v714_v0 }
  0xf6   :  { %594 = vmatpush3.bf16.msra.mxu1 %v636_v29 }
  0xf7   :  { %595 = vmatprep.subr.bf16.mxu1 %v714_v0 }
  0xfa   :  { %596 = vmatpush3.bf16.msra.mxu1 %v637_v30 }
  0xfb   :  { %597 = vmatprep.subr.bf16.mxu1 %v714_v0 }
  0xfe   :  { %598 = vmatpush3.bf16.msra.mxu1 %v638_v31 }
  0xff   :  { %599 = vmatprep.subr.bf16.mxu1 %v714_v0 }
 0x102   :  { %600 = vmatpush3.bf16.msra.mxu1 %v639_v40 }
 0x103   :  { %601 = vmatprep.subr.bf16.mxu1 %v714_v0 }
 0x106   :  { %602 = vmatpush3.bf16.msra.mxu1 %v640_v41 }
 0x107   :  { %603 = vmatprep.subr.bf16.mxu1 %v714_v0 }
 0x10a   :  { %604 = vmatpush3.bf16.msra.mxu1 %v641_v42 }
 0x10b   :  { %605 = vmatprep.subr.bf16.mxu1 %v714_v0 }
 0x10e   :  { %606 = vmatpush3.bf16.msra.mxu1 %v642_v43 }
 0x1b1   :  { %v242_v33 = vpop.f32.mrf.mxu1 }
 0x1b2   :  { %v243_v34 = vadd.f32 %v489_v32, %v242_v33 }
 0x1b3   :  { %v569_v35 = vpop.f32.mrf.mxu1 }
 0x1b4   :  { %v248_v36 = vmax.f32 %v243_v34, 0.0 }
 0x1b5   :  { %v245_v37 = vpop.f32.mrf.mxu1 }
 0x1b6   :  { %v249_v38 = vpack.c.bf16 %v248_v36, %v248_v36 }
 0x1b7   :  { %v570_v39 = vpop.f32.mrf.mxu1 }
 0x1b8   :  { %588 = vmatmul.mubr.bf16.vlgmr.msra.gmra.mxu0 %v249_v38 }
 0x278   :  { %v355_v45 = vpop.f32.mrf.mxu0 }
 0x279   :  { %v356_v46 = vadd.f32 %v498_v44, %v355_v45 }
 0x27a   :  { %v589_v47 = vpop.f32.mrf.mxu0 }
 0x27b   :  { %v361_v48 = vadd.f32 3.0, %v356_v46 }
 0x27c   :  { %v358_v49 = vpop.f32.mrf.mxu0 }
 0x27d   :  { %v362_v50 = vmax.f32 %v361_v48, 0.0 }
 0x27e   :  { %v590_v51 = vpop.f32.mrf.mxu0 }
 0x27f   :  { %v363_v52 = vmin.f32 %v362_v50, 6.0 }
 0x281   :  { %v364_v53 = vmul.f32 %v363_v52, %v356_v46 }
 0x283   :  { %v365_v54 = vmul.f32 0.16666667, %v364_v53 }
 0x285   :  { %v366_v55 = vpack.c.bf16 %v365_v54, %v365_v54 }
 0x287   :  { %608 = vmatmul.mubr.bf16.vlgmr.msra.gmra.mxu1 %v366_v55 }
 0x347   :  { %v472_v57 = vpop.f32.mrf.mxu1 }
 0x348   :  { %v473_v58 = vadd.f32 %v507_v56, %v472_v57 }
 0x349   :  { %v609_v59 = vpop.f32.mrf.mxu1 }
 0x34a   :  { %643 = vtanh.f32 %v473_v58 }
 0x34b   :  { %v475_v60 = vpop.f32.mrf.mxu1 }
 0x34d   :  { %v610_v61 = vpop.f32.mrf.mxu1 }
 0x357   :  { %v644_v62 = vpop.eup %643 }
 0x358   :  { %479 = vst [vmem:[%s838_s9] sm:$0xff] %v644_v62 }
 0x359   :  { %484 = vsyncpa [#allocation3], 1 }
 0x35a   :  { %485 = vsyncpa [#allocation5], 1 }

</bundles_post_ra>
